<compile_context>
chip_gen: v7x
topology: tpu7x:2x2x1
jax: 0.10.0
libtpu: 0.0.40
codegen_flags: <defaults>
</compile_context>

<pallas_src>
import math

import jax
import jax.numpy as jnp
from jax.experimental import pallas as pl
from jax.experimental.pallas import tpu as pltpu


def _round_up(x, m):
    return ((x + m - 1) // m) * m


def _head_kernel(pooled_ref, charge_ref, w1a_ref, w1b_ref, b1_ref, w2_ref, b2_ref, o_ref):
    # pooled_ref: (TB, H)   input dtype      charge_ref: (Bpad, 4) resident
    # w1a_ref:    (H, hidp) compute dtype    w1b_ref:    (4, hidp) f32
    # b1_ref:     (1, hidp) f32              w2_ref:     (1, hidp) f32
    # b2_ref:     (1,) f32 SMEM              o_ref:      (1, TB)   f32 (lane-dense row)
    i = pl.program_id(0)
    tb = pooled_ref.shape[0]

    # ---- Layer 1, main term on the MXU.
    # Cast the activation to the weight compute dtype here (in-kernel) so the
    # f32 activation is read from HBM exactly once (no standalone convert op).
    x = pooled_ref[...].astype(w1a_ref.dtype)
    h = jnp.dot(x, w1a_ref[...], preferred_element_type=jnp.float32)        # (TB, hidp) f32

    # ---- Layer 1, K=4 charge term as 4 VPU broadcast-FMAs (no second MXU pass).
    # Charge stays resident in VMEM across the whole grid; slice the current tile.
    start = pl.multiple_of(i * tb, tb)
    chg = charge_ref[pl.ds(start, tb), :].astype(jnp.float32)               # (TB, 4)
    for k in range(4):                                                      # static unroll
        h = h + chg[:, k:k + 1] * w1b_ref[k:k + 1, :]

    h = jnp.maximum(h + b1_ref[...], 0.0)      # bias + ReLU in f32 (no bf16 VPU on v5e)
    # Dropout: identity in eval mode.

    # ---- Layer 2 (out_features == 1): VPU multiply + XLU lane reduction
    # (cheaper than an MXU matmul with N=1).  Padded hid lanes are zero.
    y_col = jnp.sum(h * w2_ref[...], axis=-1, keepdims=True) + b2_ref[0]    # (TB, 1) f32

    # Lane-dense store: relayout the per-row results into a (1, TB) row so the
    # output writeback is a contiguous, unmasked full-lane store (single small
    # relayout of TB/8 vregs).
    o_ref[...] = y_col.reshape(1, tb).astype(o_ref.dtype)


def prepare_params(params, compute_dtype=jnp.bfloat16):
    """One-time (init-time) conversion of weight_norm params to kernel-ready tensors."""
    def eff_weight(v, g):
        v = v.astype(jnp.float32)
        return (jnp.asarray(g, jnp.float32) / jnp.sqrt(jnp.sum(v * v))) * v

    w1 = eff_weight(params["v1"], params["g1"])            # (hid, H+4)
    w2 = eff_weight(params["v2"], params["g2"])            # (1, hid)
    hid, in_dim = w1.shape
    H = in_dim - 4
    hidp = _round_up(hid, 128)                             # lane-dense hidden width
    pad = hidp - hid

    w1t = jnp.pad(w1.T, ((0, 0), (0, pad)))                # (H+4, hidp), zero pad cols
    return {
        "w1a_t": w1t[:H].astype(compute_dtype),            # (H, hidp)  MXU operand
        "w1b_t": w1t[H:].astype(jnp.float32),              # (4, hidp)  VPU FMA operand
        "b1": jnp.pad(params["b1"].astype(jnp.float32), (0, pad)).reshape(1, hidp),
        "w2_row": jnp.pad(w2.reshape(-1).astype(jnp.float32), (0, pad)).reshape(1, hidp),
        "b2": params["b2"].astype(jnp.float32).reshape(1,),
        "H": H,
        "hidp": hidp,
    }


def ccs_value_prediction_head(pooled_output, charge, kparams):
    """Forward pass. pooled_output: (B, H), charge: (B, 4) -> (B, 1) f32."""
    B, H = pooled_output.shape
    assert H == kparams["H"]
    assert charge.shape == (B, 4)
    hidp = kparams["hidp"]
    w1a = kparams["w1a_t"]

    # Batch tile: a multiple of 128 whenever there is more than one grid step
    # (keeps the output store lane-dense / unmasked and the ragged last input
    # tile legal); targets >= 2-4 steps for large B so "parallel" can shard the
    # batch across v7x's two TensorCores; capped at 1024 rows.
    if B <= 128:
        TB = _round_up(B, 8)
    else:
        TB = min(1024, _round_up(pl.cdiv(B, 4), 128))
    nsteps = pl.cdiv(B, TB)
    Bpad = nsteps * TB

    # Charge is tiny (B x 4 elements); pad to the grid extent once and keep it
    # fully resident in VMEM (no per-step 4-lane strided DMA).
    charge_pad = charge if Bpad == B else jnp.pad(charge, ((0, Bpad - B), (0, 0)))

    # Explicit VMEM budget (double-buffering accounted, 1.5x headroom) so the
    # resident-weight layout also fits v5e's 16 MiB scoped default and stays
    # within v7x's 64 MiB physical VMEM.
    pdt = jnp.dtype(pooled_output.dtype).itemsize
    wdt = jnp.dtype(w1a.dtype).itemsize
    cdt_b = jnp.dtype(charge_pad.dtype).itemsize
    est = (
        2 * TB * H * pdt               # pooled tile, double-buffered
        + 2 * Bpad * 4 * cdt_b         # resident charge
        + 2 * H * hidp * wdt           # resident W1a^T
        + 2 * 4 * hidp * 4             # resident W1b^T (f32)
        + 2 * 2 * hidp * 4             # resident b1 + w2 row (f32)
        + 2 * 1 * TB * 4               # output row
        + 2 * TB * hidp * 4            # f32 intermediates (h, h*w2)
    )
    vmem_limit = min(64 << 20, max(32 << 20, (est * 3) // 2))

    out = pl.pallas_call(
        _head_kernel,
        out_shape=jax.ShapeDtypeStruct((1, Bpad), jnp.float32),
        grid=(nsteps,),
        in_specs=[
            pl.BlockSpec((TB, H), lambda i: (i, 0)),            # pooled tile (pipelined)
            pl.BlockSpec((Bpad, 4), lambda i: (0, 0)),          # charge resident
            pl.BlockSpec((H, hidp), lambda i: (0, 0)),          # W1a^T resident
            pl.BlockSpec((4, hidp), lambda i: (0, 0)),          # W1b^T resident (f32)
            pl.BlockSpec((1, hidp), lambda i: (0, 0)),          # b1 resident (f32)
            pl.BlockSpec((1, hidp), lambda i: (0, 0)),          # w2 row resident (f32)
            pl.BlockSpec(memory_space=pltpu.MemorySpace.SMEM),  # b2 scalar
        ],
        out_specs=pl.BlockSpec((1, TB), lambda i: (0, i)),      # lane-dense output row
        compiler_params=pltpu.CompilerParams(
            dimension_semantics=("parallel",),
            vmem_limit_bytes=int(vmem_limit),
        ),
    )(pooled_output, charge_pad, w1a, kparams["w1b_t"], kparams["b1"],
      kparams["w2_row"], kparams["b2"])

    # Cheap wrapper-side plumbing back to the module's (B, 1) output.
    return out[0, :B].reshape(B, 1)


def init_params(key, hidden_size, dtype=jnp.float32):
    """Deterministic init mimicking nn.Linear + weight_norm(dim=None)."""
    in_dim = hidden_size + 4
    hid_dim = int(hidden_size * 2 / 3)
    out_dim = 1
    k1, k2, k3, k4 = jax.random.split(key, 4)

    def linear_init(kw, kb, fan_in, fan_out):
        bound = 1.0 / math.sqrt(fan_in)
        w = jax.random.uniform(kw, (fan_out, fan_in), dtype, -bound, bound)
        b = jax.random.uniform(kb, (fan_out,), dtype, -bound, bound)
        return w, b

    v1, b1 = linear_init(k1, k2, in_dim, hid_dim)
    v2, b2 = linear_init(k3, k4, hid_dim, out_dim)
    # weight_norm init: g = ||v||_F  (so initial effective weight equals v)
    g1 = jnp.sqrt(jnp.sum(v1 * v1))
    g2 = jnp.sqrt(jnp.sum(v2 * v2))
    return {"v1": v1, "g1": g1, "b1": b1, "v2": v2, "g2": g2, "b2": b2}


def reference(pooled_output, charge, params):
    """Pure-JAX f32 reference for sanity checking."""
    def eff_weight(v, g):
        return (g / jnp.sqrt(jnp.sum(v * v))) * v
    x = jnp.concatenate([pooled_output, charge], axis=1)
    h = jnp.maximum(x @ eff_weight(params["v1"], params["g1"]).T + params["b1"], 0.0)
    return h @ eff_weight(params["v2"], params["g2"]).T + params["b2"]


if __name__ == "__main__":
    hidden_size = 32
    batch = 8

    key = jax.random.PRNGKey(0)
    k_params, k_pool, k_charge = jax.random.split(key, 3)

    params = init_params(k_params, hidden_size)
    pooled_output = jax.random.normal(k_pool, (batch, hidden_size), jnp.float32)
    # charge is typically a one-hot charge-state encoding (B, 4)
    charge = jax.nn.one_hot(
        jax.random.randint(k_charge, (batch,), 0, 4), 4, dtype=jnp.float32
    )

    y_ref = reference(pooled_output, charge, params)

    # f32 compute path: tight check against the pure-JAX reference.
    kp_f32 = prepare_params(params, compute_dtype=jnp.float32)
    y32 = jax.block_until_ready(ccs_value_prediction_head(pooled_output, charge, kp_f32))
    assert y32.shape == (batch, 1)
    assert jnp.allclose(y32, y_ref, atol=1e-5, rtol=1e-5)

    # bf16 compute path (production default): loose check (bf16 weights/activations).
    kp_bf16 = prepare_params(params)  # bfloat16
    y16 = jax.block_until_ready(ccs_value_prediction_head(pooled_output, charge, kp_bf16))
    assert y16.shape == (batch, 1)
    assert jnp.allclose(y16, y_ref, atol=5e-2, rtol=5e-2)

    print("KERNEL_OK")
</pallas_src>

<mosaic_0001>
module attributes {stable_mosaic.version = 11 : i64} {
  func.func @_head_kernel(%arg0: i32, %arg1: memref<8x32xf32, #tpu.memory_space<vmem>>, %arg2: memref<8x4xf32, #tpu.memory_space<vmem>>, %arg3: memref<32x128xf32, #tpu.memory_space<vmem>>, %arg4: memref<4x128xf32, #tpu.memory_space<vmem>>, %arg5: memref<1x128xf32, #tpu.memory_space<vmem>>, %arg6: memref<1x128xf32, #tpu.memory_space<vmem>>, %arg7: memref<1xf32, #tpu.memory_space<smem>>, %arg8: memref<1x8xf32, #tpu.memory_space<vmem>>) attributes {dimension_semantics = [#tpu.dimension_semantics<parallel>], iteration_bounds = array<i64: 1>, scalar_prefetch = 0 : i64, scratch_operands = 0 : i64, tpu.core_type = #tpu.core_type<tc>, window_params = [{transform_indices = @transform_0, window_bounds = array<i64: 8, 32>}, {pipeline_mode = #tpu.pipeline_mode<synchronous>, transform_indices = @transform_1, window_bounds = array<i64: 8, 4>}, {pipeline_mode = #tpu.pipeline_mode<synchronous>, transform_indices = @transform_2, window_bounds = array<i64: 32, 128>}, {pipeline_mode = #tpu.pipeline_mode<synchronous>, transform_indices = @transform_3, window_bounds = array<i64: 4, 128>}, {pipeline_mode = #tpu.pipeline_mode<synchronous>, transform_indices = @transform_4, window_bounds = array<i64: 1, 128>}, {pipeline_mode = #tpu.pipeline_mode<synchronous>, transform_indices = @transform_5, window_bounds = array<i64: 1, 128>}, {transform_indices = @transform_6, window_bounds = array<i64: 1>}, {transform_indices = @transform_7, window_bounds = array<i64: 1, 8>}]} {
    %c0 = arith.constant 0 : index
    %c0_0 = arith.constant 0 : index
    %0 = vector.load %arg1[%c0, %c0_0] : memref<8x32xf32, #tpu.memory_space<vmem>>, vector<8x32xf32>
    %c0_1 = arith.constant 0 : index
    %c0_2 = arith.constant 0 : index
    %1 = vector.load %arg3[%c0_1, %c0_2] : memref<32x128xf32, #tpu.memory_space<vmem>>, vector<32x128xf32>
    %cst = arith.constant dense<0.000000e+00> : vector<8x128xf32>
    %2 = tpu.matmul %0, %1, %cst {dimension_numbers = #tpu.dot_dimension_numbers<[1], [0], [0], [1], [0, 0, 1, 1], [], []>} : vector<8x32xf32>, vector<32x128xf32>, vector<8x128xf32> -> vector<8x128xf32>
    %c8_i32 = arith.constant 8 : i32
    %3 = arith.muli %arg0, %c8_i32 : i32
    %4 = tpu.assume_multiple %3, 8 : i32
    %5 = arith.index_cast %4 : i32 to index
    %c0_3 = arith.constant 0 : index
    %6 = vector.load %arg2[%5, %c0_3] : memref<8x4xf32, #tpu.memory_space<vmem>>, vector<8x4xf32>
    %7 = vector.extract_strided_slice %6 {offsets = [0, 0], sizes = [8, 1], strides = [1, 1]} : vector<8x4xf32> to vector<8x1xf32>
    %c0_4 = arith.constant 0 : index
    %c0_5 = arith.constant 0 : index
    %8 = vector.load %arg4[%c0_4, %c0_5] : memref<4x128xf32, #tpu.memory_space<vmem>>, vector<1x128xf32>
    %9 = vector.broadcast %7 : vector<8x1xf32> to vector<8x128xf32>
    %10 = vector.broadcast %8 : vector<1x128xf32> to vector<8x128xf32>
    %11 = arith.mulf %9, %10 : vector<8x128xf32>
    %12 = arith.addf %2, %11 : vector<8x128xf32>
    %13 = vector.extract_strided_slice %6 {offsets = [0, 1], sizes = [8, 1], strides = [1, 1]} : vector<8x4xf32> to vector<8x1xf32>
    %c1 = arith.constant 1 : index
    %c0_6 = arith.constant 0 : index
    %14 = vector.load %arg4[%c1, %c0_6] : memref<4x128xf32, #tpu.memory_space<vmem>>, vector<1x128xf32>
    %15 = vector.broadcast %13 : vector<8x1xf32> to vector<8x128xf32>
    %16 = vector.broadcast %14 : vector<1x128xf32> to vector<8x128xf32>
    %17 = arith.mulf %15, %16 : vector<8x128xf32>
    %18 = arith.addf %12, %17 : vector<8x128xf32>
    %19 = vector.extract_strided_slice %6 {offsets = [0, 2], sizes = [8, 1], strides = [1, 1]} : vector<8x4xf32> to vector<8x1xf32>
    %c2 = arith.constant 2 : index
    %c0_7 = arith.constant 0 : index
    %20 = vector.load %arg4[%c2, %c0_7] : memref<4x128xf32, #tpu.memory_space<vmem>>, vector<1x128xf32>
    %21 = vector.broadcast %19 : vector<8x1xf32> to vector<8x128xf32>
    %22 = vector.broadcast %20 : vector<1x128xf32> to vector<8x128xf32>
    %23 = arith.mulf %21, %22 : vector<8x128xf32>
    %24 = arith.addf %18, %23 : vector<8x128xf32>
    %25 = vector.extract_strided_slice %6 {offsets = [0, 3], sizes = [8, 1], strides = [1, 1]} : vector<8x4xf32> to vector<8x1xf32>
    %c3 = arith.constant 3 : index
    %c0_8 = arith.constant 0 : index
    %26 = vector.load %arg4[%c3, %c0_8] : memref<4x128xf32, #tpu.memory_space<vmem>>, vector<1x128xf32>
    %27 = vector.broadcast %25 : vector<8x1xf32> to vector<8x128xf32>
    %28 = vector.broadcast %26 : vector<1x128xf32> to vector<8x128xf32>
    %29 = arith.mulf %27, %28 : vector<8x128xf32>
    %30 = arith.addf %24, %29 : vector<8x128xf32>
    %c0_9 = arith.constant 0 : index
    %c0_10 = arith.constant 0 : index
    %31 = vector.load %arg5[%c0_9, %c0_10] : memref<1x128xf32, #tpu.memory_space<vmem>>, vector<1x128xf32>
    %32 = vector.broadcast %31 : vector<1x128xf32> to vector<8x128xf32>
    %33 = arith.addf %30, %32 : vector<8x128xf32>
    %cst_11 = arith.constant 0.000000e+00 : f32
    %34 = vector.broadcast %cst_11 : f32 to vector<8x128xf32>
    %35 = arith.maximumf %33, %34 : vector<8x128xf32>
    %c0_12 = arith.constant 0 : index
    %c0_13 = arith.constant 0 : index
    %36 = vector.load %arg6[%c0_12, %c0_13] : memref<1x128xf32, #tpu.memory_space<vmem>>, vector<1x128xf32>
    %37 = vector.broadcast %36 : vector<1x128xf32> to vector<8x128xf32>
    %38 = arith.mulf %35, %37 : vector<8x128xf32>
    %cst_14 = arith.constant dense<0.000000e+00> : vector<8xf32>
    %39 = vector.multi_reduction <add>, %38, %cst_14 [1] : vector<8x128xf32> to vector<8xf32>
    %40 = vector.shape_cast %39 : vector<8xf32> to vector<8x1xf32>
    %c0_15 = arith.constant 0 : index
    %41 = memref.load %arg7[%c0_15] : memref<1xf32, #tpu.memory_space<smem>>
    %42 = vector.broadcast %41 : f32 to vector<8x1xf32>
    %43 = arith.addf %40, %42 : vector<8x1xf32>
    %44 = vector.shape_cast %43 : vector<8x1xf32> to vector<1x8xf32>
    %c0_16 = arith.constant 0 : index
    %c0_17 = arith.constant 0 : index
    %45 = vector.load %arg8[%c0_16, %c0_17] : memref<1x8xf32, #tpu.memory_space<vmem>>, vector<1x8xf32>
    tpu.vector_store %arg8[%c0_16, %c0_17], %44 {strides = array<i32>} : memref<1x8xf32, #tpu.memory_space<vmem>>, vector<1x8xf32>,
    return
  }
  func.func @transform_0(%arg0: i32) -> (i32, i32) {
    %c0_i32 = arith.constant 0 : i32
    %c0_i32_0 = arith.constant 0 : i32
    return %arg0, %c0_i32 : i32, i32
  }
  func.func @transform_1(%arg0: i32) -> (i32, i32) {
    %c0_i32 = arith.constant 0 : i32
    %c0_i32_0 = arith.constant 0 : i32
    %c0_i32_1 = arith.constant 0 : i32
    return %c0_i32, %c0_i32_0 : i32, i32
  }
  func.func @transform_2(%arg0: i32) -> (i32, i32) {
    %c0_i32 = arith.constant 0 : i32
    %c0_i32_0 = arith.constant 0 : i32
    %c0_i32_1 = arith.constant 0 : i32
    return %c0_i32, %c0_i32_0 : i32, i32
  }
  func.func @transform_3(%arg0: i32) -> (i32, i32) {
    %c0_i32 = arith.constant 0 : i32
    %c0_i32_0 = arith.constant 0 : i32
    %c0_i32_1 = arith.constant 0 : i32
    return %c0_i32, %c0_i32_0 : i32, i32
  }
  func.func @transform_4(%arg0: i32) -> (i32, i32) {
    %c0_i32 = arith.constant 0 : i32
    %c0_i32_0 = arith.constant 0 : i32
    %c0_i32_1 = arith.constant 0 : i32
    return %c0_i32, %c0_i32_0 : i32, i32
  }
  func.func @transform_5(%arg0: i32) -> (i32, i32) {
    %c0_i32 = arith.constant 0 : i32
    %c0_i32_0 = arith.constant 0 : i32
    %c0_i32_1 = arith.constant 0 : i32
    return %c0_i32, %c0_i32_0 : i32, i32
  }
  func.func @transform_6(%arg0: i32) -> i32 {
    %c0_i32 = arith.constant 0 : i32
    %c0_i32_0 = arith.constant 0 : i32
    return %c0_i32 : i32
  }
  func.func @transform_7(%arg0: i32) -> (i32, i32) {
    %c0_i32 = arith.constant 0 : i32
    %c0_i32_0 = arith.constant 0 : i32
    return %c0_i32, %arg0 : i32, i32
  }
}

</mosaic_0001>

<bundles_post_ra>
// kernel: tpu_custom_call.1
= control target key start
LH: loop header
LB: loop body
LE: loop exit
PB: predicated region body
PF: predicated region fallthrough
CT: control target
= control target key end

     0   :  { %13 = vsyncpa [#allocation4], 0  ;;  %s410_s0 = inlined_call_operand.vmem [shape: f32[8,32], index: 0, kind: input, shape index: {}]   ;;  %s411_s1 = inlined_call_operand.vmem [shape: f32[8,4], index: 1, kind: input, shape index: {}]   ;;  %s412_s2 = inlined_call_operand.hbm [shape: f32[32,128], index: 2, kind: input, shape index: {}]   ;;  %s413_s3 = inlined_call_operand.vmem [shape: f32[4,128], index: 3, kind: input, shape index: {}]   ;;  %s414_s4 = inlined_call_operand.vmem [shape: f32[1,128], index: 4, kind: input, shape index: {}]   ;;  %s415_s5 = inlined_call_operand.vmem [shape: f32[1,128], index: 5, kind: input, shape index: {}]   ;;  %s416_s6 = inlined_call_operand.<no memory space> [shape: f32[1], index: 6, kind: input, shape index: {}]   ;;  %s417_s7 = inlined_call_operand.hbm [shape: f32[1,8], index: 7, kind: output, shape index: {}]  }
   0x1   :  { %14 = vsyncpa [#allocation5], 0  ;;  %s308_s24 = smov [#allocation3]   ;;  %s260_s28 = scalar_lea.hbm %s412_s2, 512 }
   0x2   :  { %s24_s25 = sshll.u32 %s308_s24, 4  ;;  %p261_p0 = scmp.ne.s32.totalorder %s412_s2, %s260_s28  ;;  %s25_s25 = int_to_ptr.vmem [resolvable:$true] %s24_s25 }
   0x3   :  { %p264_p1 = scmp.lt.u32.totalorder %s260_s28, %s412_s2 }
   0x5   :  { %p266_p2 = pnand %p264_p1, %p261_p0 }
   0x7   :  { %269 = shalt.err (!%p266_p2)
}
   0x8   :  { %s270_s10 = scalar_lea.vmem %s25_s25, 512  ;;  %p275_p4 = scmp.lt.s32.totalorder %s25_s25, %s25_s25 }
   0x9   :  { %p271_p3 = scmp.ne.s32.totalorder %s25_s25, %s270_s10  ;;  %p276_p5 = scmp.lt.s32.totalorder %s270_s10, %s270_s10 }
   0xb   :  { %p277_p6 = por %p276_p5, %p275_p4 }
   0xd   :  { %p278_p7 = pnand %p277_p6, %p271_p3 }
   0xf   :  { %281 = shalt.err (!%p278_p7)
}
  0x10   :  { %s309_s11 = smov 128   ;;  %s310_s12 = smov 8  }
  0x11   :  { %30 = dma.hbm_to_vmem [thread:$0]  %s412_s2, 512, %s25_s25, [#allocation4], %s309_s11, %s309_s11, %s310_s12  }
  0x12   :  { %304 = dma.done.wait [#allocation4], 512  }
  0x13   :  { %305 = vsyncadd [#allocation4], 4294966784  ;;  %v311_v0 = vmov 0.0|0.0   ;;  %vm312_vm0 = vmmov 0   ;;  %v313_v1 = vmov 0.0   ;;  %v314_v2 = vmov 0  }
  0x14   :  { %238 = vmatprep.subr.bf16.mxu0 %v311_v0  ;;  %235 = vmatprep.mubr.msk.f32.mxu0 %vm312_vm0, %v313_v1  ;;  %v315_v3 = vmov 2   ;;  %v43_v4 = vld [vmem:[#allocation3] sm:$0xff]  ;;  %v44_v5 = vld [vmem:[#allocation3 + $0x8] sm:$0xff]  ;;  %v45_v6 = vld [vmem:[#allocation3 + $0x10] sm:$0xff]  ;;  %v316_v11 = vmov 1   ;;  %v317_v12 = vmov 3   ;;  %v191_v37 = vlaneseq }
  0x15   :  { %255 = vset.pattern.permute.xlu0 %v314_v2  ;;  %257 = vset.pattern.permute.xlu1 %v315_v3  ;;  %v239_v7 = vpack.c.bf16 %v44_v5, %v43_v4  ;;  %v46_v8 = vld [vmem:[#allocation3 + $0x18] sm:$0xff]  ;;  %v49_v9 = vld [vmem:[%s411_s1] sm:$0xff]  ;;  %vm61_vm1 = vcmask 261120   ;;  %v188_v40 = vstv %s416_s6  ;;  %s318_s29 = smov [#allocation6]   ;;  %vm198_vm2 = vcmask 57344  }
  0x16   :  { %53 = vperm.xlu0 %255, %v49_v9   ;;  %148 = vperm.xlu1 %257, %v49_v9   ;;  %v242_v10 = vpack.c.bf16 %v46_v8, %v45_v6  ;;  %v42_v13 = vld [vmem:[%s410_s0] sm:$0xff]  ;;  %v192_v38 = vand.u32 127, %v191_v37  ;;  %v194_v39 = vshrl.u32 %v191_v37, 7 }
  0x17   :  { %240 = vmatpush3.bf16.msra.mxu0 %v239_v7  ;;  %v215_v16 = vld [vmem:[%s413_s3] ss:$0 sm:$0xff]  ;;  %v217_v17 = vld [vmem:[%s413_s3 + $0x1] ss:$0 sm:$0xff]  ;;  %v218_v21 = vld [vmem:[%s413_s3 + $0x2] ss:$0 sm:$0xff] }
  0x18   :  { %241 = vmatprep.subr.bf16.mxu0 %v311_v0  ;;  %v219_v23 = vld [vmem:[%s413_s3 + $0x3] ss:$0 sm:$0xff]  ;;  %v220_v31 = vld [vmem:[%s414_s4] ss:$0 sm:$0xff]  ;;  %v195_v41 = vsub.s32 %v192_v38, %v194_v39  ;;  %s206_s4 = sshll.u32 %s318_s29, 4  ;;  %s207_s4 = int_to_ptr.vmem [resolvable:$true] %s206_s4 }
  0x19   :  { %v221_v34 = vld [vmem:[%s415_s5] ss:$0 sm:$0xff]  ;;  %s282_s5 = scalar_lea.vmem %s207_s4, 16  ;;  %s286_s30 = scalar_lea.vmem %s207_s4, 32 }
  0x1a   :  { %256 = vset.pattern.permute.xlu0 %v316_v11  ;;  %258 = vset.pattern.permute.xlu1 %v317_v12  ;;  %p283_p8 = scmp.ne.s32.totalorder %s207_s4, %s282_s5  ;;  %p287_p9 = scmp.lt.s32.totalorder %s207_s4, %s207_s4 }
  0x1b   :  { %243 = vmatpush3.bf16.msra.mxu0 %v242_v10  ;;  %137 = vperm.xlu0 %256, %v49_v9   ;;  %p288_p10 = scmp.lt.s32.totalorder %s286_s30, %s282_s5 }
  0x1c   :  { %159 = vperm.xlu1 %258, %v49_v9  }
  0x1d   :  { %p289_p11 = por %p288_p10, %p287_p9 }
  0x1e   :  { %236 = vmatmul.mubr.msk.f32.vlgmr.msra.gmra.mrb[0].mxu0 %vm61_vm1, %v42_v13 }
  0x1f   :  { %259 = vset.pattern.permute.xlu0 %v317_v12  ;;  %p290_p12 = pnand %p289_p11, %p283_p8 }
  0x95   :  { %v54_v14 = vpop.permute.xlu0 %53  ;;  %v149_v15 = vpop.permute.xlu1 %148 }
  0x96   :  { %v60_v19 = vmul.f32 %v215_v16, %v54_v14  ;;  %v155_v27 = vmul.f32 %v218_v21, %v149_v15 }
  0x9a   :  { %v138_v18 = vpop.permute.xlu0 %137 }
  0x9b   :  { %v144_v20 = vmul.f32 %v217_v17, %v138_v18  ;;  %v160_v24 = vpop.permute.xlu1 %159 }
  0x9c   :  { %v166_v29 = vmul.f32 %v219_v23, %v160_v24 }
  0xf1   :  { %v131_v22 = vpop.f32.mrb[0].mxu0 }
  0xf2   :  { %v132_v25 = vadd.f32 %v131_v22, %v60_v19  ;;  %v237_v26 = vpop.f32.mrb[1].mxu0 }
  0xf4   :  { %v145_v28 = vadd.f32 %v144_v20, %v132_v25 }
  0xf6   :  { %v156_v30 = vadd.f32 %v155_v27, %v145_v28 }
  0xf8   :  { %v167_v32 = vadd.f32 %v166_v29, %v156_v30 }
  0xfa   :  { %v175_v33 = vadd.f32 %v220_v31, %v167_v32 }
  0xfc   :  { %v176_v35 = vmax.f32 %v175_v33, 0.0 }
  0xfe   :  { %v184_v36 = vmul.f32 %v221_v34, %v176_v35 }
 0x100   :  { %185 = vadd.xlane.f32.xlu1 %v184_v36 }
 0x18d   :  { %v186_v42 = vpop.xlane.xlu1 %185 }
 0x18e   :  { %v189_v43 = vadd.f32 %v188_v40, %v186_v42 }
 0x190   :  { %v196_v44 = vrot.slane %v189_v43, %v195_v41 }
 0x192   :  { %199 = vst.msk [vmem:[#allocation6] sm:$0x1] %vm198_vm2, %v196_v44 }
 0x193   :  { %293 = shalt.err (!%p290_p12)
}
 0x194   :  { %s294_s6 = scalar_lea.hbm %s417_s7, 16 }
 0x195   :  { %p295_p13 = scmp.ne.s32.totalorder %s417_s7, %s294_s6  ;;  %p298_p0 = scmp.lt.u32.totalorder %s294_s6, %s417_s7 }
 0x197   :  { %p300_p1 = pnand %p298_p0, %p295_p13 }
 0x199   :  { %303 = shalt.err (!%p300_p1)
}
 0x19a   :  { %209 = dma.vmem_to_hbm [thread:$0]  %s207_s4, 16, %s417_s7, [#allocation5]  }
 0x19b   :  { %306 = dma.done.wait [#allocation5], 16  }
 0x19c   :  { %307 = vsyncadd [#allocation5], 4294967280 }
 0x19d   :  { %213 = vsyncpa [#allocation4], 1 }
 0x19e   :  { %214 = vsyncpa [#allocation5], 1 }

</bundles_post_ra>
